<compile_context>
chip_gen: v5e
topology: v5e:2x2
jax: 0.10.0
libtpu: 0.0.40
codegen_flags: <defaults>
</compile_context>

<pallas_src>
import jax
import jax.numpy as jnp
from jax import lax
from jax.experimental import pallas as pl
from jax.experimental.pallas import tpu as pltpu


def _triplet_loss_kernel(trip_ref, xt_ref, out_ref, acc_ref):
    # trip_ref : VMEM (3, TBLK)   int32   -- rows are (i, j, k) indices for this triplet block
    # xt_ref   : VMEM (TD, N)     float32 -- current D-chunk of x^T (whole x^T when it fits)
    # out_ref  : VMEM (1, TBLK)   float32 -- per-triplet softplus values
    # acc_ref  : VMEM (1, 2*TBLK) float32 -- running [sum_d (x_i-x_j)^2 | sum_d (x_i-x_k)^2]
    dk = pl.program_id(1)
    n = xt_ref.shape[1]
    tblk = trip_ref.shape[1]

    @pl.when(dk == 0)
    def _():
        acc_ref[...] = jnp.zeros_like(acc_ref)

    idx_i = trip_ref[0:1, :]                                  # (1, TBLK)
    idx_j = trip_ref[1:2, :]
    idx_k = trip_ref[2:3, :]
    # Anchor / other index per output column of the fused (2*TBLK)-wide selector.
    idx_a = jnp.concatenate([idx_i, idx_i], axis=1)           # (1, 2*TBLK)
    idx_b = jnp.concatenate([idx_j, idx_k], axis=1)           # (1, 2*TBLK)

    rows = lax.broadcasted_iota(jnp.int32, (n, 2 * tblk), 0)
    sel = (rows == idx_a).astype(jnp.float32) - (rows == idx_b).astype(jnp.float32)

    # Single fused MXU matmul: columns [0, TBLK) give x_i - x_j, [TBLK, 2*TBLK) give x_i - x_k.
    diff = jnp.dot(xt_ref[...], sel, preferred_element_type=jnp.float32)   # (TD, 2*TBLK)
    acc_ref[...] += jnp.sum(diff * diff, axis=0, keepdims=True)            # (1, 2*TBLK)

    @pl.when(dk == pl.num_programs(1) - 1)
    def _():
        d2 = acc_ref[...]
        z = d2[:, :tblk] - d2[:, tblk:]        # d_ij - d_ik (squared L2 >= 0 => clamp implicit)
        out_ref[...] = jnp.maximum(z, 0.0) + jnp.log1p(jnp.exp(-jnp.abs(z)))


def triplet_loss(x, triplets, *, tblk=256, td=None, slab_budget_bytes=36 << 20):
    """x: (N, D) float, triplets: (T, 3) int rows of (i, j, k). Returns scalar f32 loss."""
    n, d = x.shape
    t = int(triplets.shape[0])
    if t == 0:                                               # guard: empty triplet list
        return jnp.float32(0.0)

    x = x.astype(jnp.float32)

    def rup(v, m):
        return -(-v // m) * m

    lane_n = rup(n, 128)                                     # lane-padded row width in VMEM

    # --- choose the D chunking (resident slab vs. pipelined D-reduction) -------------------
    if td is None:
        if rup(d, 8) * lane_n * 4 <= slab_budget_bytes:
            td = d                                           # whole x^T resident, single copy
        else:
            # double-buffered chunks; keep both pipeline buffers within the slab budget
            td = max(8, ((slab_budget_bytes // 2) // (lane_n * 4)) // 8 * 8)
    td = int(td)
    if td < d:
        td = rup(td, 8)                                      # tiled dim must be 8-aligned
    if td >= d:
        td, d_tiles = d, 1
    else:
        d_tiles = -(-d // td)
    d_pad = d_tiles * td

    # --- host-side layout plumbing ----------------------------------------------------------
    xt = x.T                                                 # (D, N)
    if d_pad != d:
        xt = jnp.zeros((d_pad, n), jnp.float32).at[:d, :].set(xt)   # zero rows are harmless

    num_blocks = -(-t // tblk)
    t_pad = num_blocks * tblk
    trips_t = jnp.zeros((3, t_pad), jnp.int32).at[:, :t].set(triplets.astype(jnp.int32).T)

    # --- xt spec: fully resident (no double buffer) or D-tiled (default pipelining) ---------
    if d_tiles == 1:
        xt_spec = pl.BlockSpec(memory_space=pltpu.MemorySpace.VMEM)   # single VMEM copy
        xt_bufs, rows_xt = 1, rup(d_pad, 8)
    else:
        xt_spec = pl.BlockSpec((td, n), lambda b, k: (k, 0))          # double-buffered chunks
        xt_bufs, rows_xt = 2, td

    # --- VMEM limit: size to the real buffers, cap well below physical (v7x headroom) -------
    bytes_x = xt_bufs * rows_xt * lane_n * 4
    bytes_trip = 2 * 8 * tblk * 4
    bytes_out = 2 * 8 * tblk * 4
    bytes_acc = 8 * (2 * tblk) * 4
    bytes_work = (4 * rup(n, 8) + 2 * rows_xt + 16) * (2 * tblk) * 4  # selector/diff temps
    need = bytes_x + bytes_trip + bytes_out + bytes_acc + bytes_work
    try:
        phys_vmem = int(pltpu.get_tpu_info().vmem_capacity_bytes)
    except Exception:
        phys_vmem = 64 << 20
    vmem_cap = max(32 << 20, phys_vmem - (8 << 20))          # never request all of physical VMEM
    vmem_limit = int(min(vmem_cap, max(4 << 20, 2 * need)))

    per_triplet = pl.pallas_call(
        _triplet_loss_kernel,
        out_shape=jax.ShapeDtypeStruct((1, t_pad), jnp.float32),
        grid=(num_blocks, d_tiles),                          # triplet blocks x D chunks
        in_specs=[
            pl.BlockSpec((3, tblk), lambda b, k: (0, b)),    # triplet index block (b only)
            xt_spec,
        ],
        out_specs=pl.BlockSpec((1, tblk), lambda b, k: (0, b)),
        scratch_shapes=[pltpu.VMEM((1, 2 * tblk), jnp.float32)],
        compiler_params=pltpu.CompilerParams(
            dimension_semantics=("parallel", "arbitrary"),   # b across cores, D is a reduction
            vmem_limit_bytes=vmem_limit,
        ),
    )(trips_t, xt)

    # Padded triplet lanes are simply ignored by this static slice; mean in f32.
    return jnp.sum(per_triplet[0, :t]) / jnp.float32(t)


def _reference_loss(x, triplets):
    # Mirrors TripletLoss.forward: clamped pairwise_distances expansion followed by
    # log(1 + exp(d_ij - d_ik)), with the softplus in its numerically stable form.
    x = x.astype(jnp.float32)
    xn = jnp.sum(x * x, axis=1)
    dist = jnp.clip(xn[:, None] + xn[None, :] - 2.0 * x @ x.T, 0.0, None)
    i, j, k = triplets[:, 0], triplets[:, 1], triplets[:, 2]
    z = dist[i, j] - dist[i, k]
    return jnp.mean(jnp.logaddexp(0.0, z))


if __name__ == "__main__":
    key = jax.random.PRNGKey(0)
    kx1, kt1, kx2, kt2 = jax.random.split(key, 4)

    # Case 1: small; whole x^T resident in VMEM (single-buffered), one fused 512-wide matmul.
    N1, D1, T1 = 8, 32, 6
    x1 = jax.random.normal(kx1, (N1, D1), dtype=jnp.float32)
    tr1 = jax.random.randint(kt1, (T1, 3), 0, N1, dtype=jnp.int32)
    loss1 = jax.block_until_ready(triplet_loss(x1, tr1))
    ref1 = jax.block_until_ready(_reference_loss(x1, tr1))
    assert jnp.allclose(loss1, ref1, rtol=1e-3, atol=1e-3), (loss1, ref1)

    # Case 2: exercises multiple triplet blocks, the D-tiled reduction path (forced td=8)
    # and D padding (D=20 is not a multiple of the chunk).
    N2, D2, T2 = 16, 20, 300
    x2 = jax.random.normal(kx2, (N2, D2), dtype=jnp.float32)
    tr2 = jax.random.randint(kt2, (T2, 3), 0, N2, dtype=jnp.int32)
    loss2 = jax.block_until_ready(triplet_loss(x2, tr2, tblk=128, td=8))
    ref2 = jax.block_until_ready(_reference_loss(x2, tr2))
    assert jnp.allclose(loss2, ref2, rtol=1e-3, atol=1e-3), (loss2, ref2)

    print("KERNEL_OK")
</pallas_src>

<mosaic_0001>
module attributes {stable_mosaic.version = 11 : i64} {
  func.func @_triplet_loss_kernel(%arg0: i32, %arg1: i32, %arg2: memref<3x256xi32, #tpu.memory_space<vmem>>, %arg3: memref<32x8xf32, #tpu.memory_space<vmem>>, %arg4: memref<1x256xf32, #tpu.memory_space<vmem>>, %arg5: memref<1x512xf32, #tpu.memory_space<vmem>>) attributes {dimension_semantics = [#tpu.dimension_semantics<parallel>, #tpu.dimension_semantics<arbitrary>], iteration_bounds = array<i64: 1, 1>, scalar_prefetch = 0 : i64, scratch_operands = 1 : i64, tpu.core_type = #tpu.core_type<tc>, window_params = [{transform_indices = @transform_0, window_bounds = array<i64: 3, 256>}, {pipeline_mode = #tpu.pipeline_mode<synchronous>, transform_indices = @transform_1, window_bounds = array<i64: 32, 8>}, {transform_indices = @transform_2, window_bounds = array<i64: 1, 256>}]} {
    %c0_i32 = arith.constant 0 : i32
    %0 = arith.cmpi eq, %arg1, %c0_i32 : i32
    %1 = arith.extui %0 : i1 to i32
    %c0_i32_0 = arith.constant 0 : i32
    %2 = arith.cmpi ne, %1, %c0_i32_0 : i32
    scf.if %2 {
      %cst_13 = arith.constant 0.000000e+00 : f32
      %29 = vector.broadcast %cst_13 : f32 to vector<1x512xf32>
      %c0_14 = arith.constant 0 : index
      %c0_15 = arith.constant 0 : index
      %30 = vector.load %arg5[%c0_14, %c0_15] : memref<1x512xf32, #tpu.memory_space<vmem>>, vector<1x512xf32>
      tpu.vector_store %arg5[%c0_14, %c0_15], %29 {strides = array<i32>} : memref<1x512xf32, #tpu.memory_space<vmem>>, vector<1x512xf32>,
    } else {
    }
    %c0 = arith.constant 0 : index
    %c0_1 = arith.constant 0 : index
    %3 = vector.load %arg2[%c0, %c0_1] : memref<3x256xi32, #tpu.memory_space<vmem>>, vector<1x256xi32>
    %c1 = arith.constant 1 : index
    %c0_2 = arith.constant 0 : index
    %4 = vector.load %arg2[%c1, %c0_2] : memref<3x256xi32, #tpu.memory_space<vmem>>, vector<1x256xi32>
    %c2 = arith.constant 2 : index
    %c0_3 = arith.constant 0 : index
    %5 = vector.load %arg2[%c2, %c0_3] : memref<3x256xi32, #tpu.memory_space<vmem>>, vector<1x256xi32>
    %6 = tpu.concatenate %3, %3 in 1 : vector<1x256xi32>, vector<1x256xi32> -> vector<1x512xi32>
    %7 = tpu.concatenate %4, %5 in 1 : vector<1x256xi32>, vector<1x256xi32> -> vector<1x512xi32>
    %8 = tpu.iota {dimensions = array<i32: 0>} : vector<8x512xi32>
    %9 = vector.broadcast %6 : vector<1x512xi32> to vector<8x512xi32>
    %10 = arith.cmpi eq, %8, %9 : vector<8x512xi32>
    %11 = arith.extui %10 : vector<8x512xi1> to vector<8x512xi32>
    %12 = arith.sitofp %11 : vector<8x512xi32> to vector<8x512xf32>
    %13 = vector.broadcast %7 : vector<1x512xi32> to vector<8x512xi32>
    %14 = arith.cmpi eq, %8, %13 : vector<8x512xi32>
    %15 = arith.extui %14 : vector<8x512xi1> to vector<8x512xi32>
    %16 = arith.sitofp %15 : vector<8x512xi32> to vector<8x512xf32>
    %17 = arith.subf %12, %16 : vector<8x512xf32>
    %c0_4 = arith.constant 0 : index
    %c0_5 = arith.constant 0 : index
    %18 = vector.load %arg3[%c0_4, %c0_5] : memref<32x8xf32, #tpu.memory_space<vmem>>, vector<32x8xf32>
    %cst = arith.constant dense<0.000000e+00> : vector<32x512xf32>
    %19 = tpu.matmul %18, %17, %cst {dimension_numbers = #tpu.dot_dimension_numbers<[1], [0], [0], [1], [0, 0, 1, 1], [], []>} : vector<32x8xf32>, vector<8x512xf32>, vector<32x512xf32> -> vector<32x512xf32>
    %c0_6 = arith.constant 0 : index
    %c0_7 = arith.constant 0 : index
    %20 = vector.load %arg5[%c0_6, %c0_7] : memref<1x512xf32, #tpu.memory_space<vmem>>, vector<1x512xf32>
    %21 = arith.mulf %19, %19 : vector<32x512xf32>
    %cst_8 = arith.constant dense<0.000000e+00> : vector<512xf32>
    %22 = vector.multi_reduction <add>, %21, %cst_8 [0] : vector<32x512xf32> to vector<512xf32>
    %23 = vector.shape_cast %22 : vector<512xf32> to vector<1x512xf32>
    %24 = arith.addf %20, %23 : vector<1x512xf32>
    %c0_9 = arith.constant 0 : index
    %c0_10 = arith.constant 0 : index
    %25 = vector.load %arg5[%c0_9, %c0_10] : memref<1x512xf32, #tpu.memory_space<vmem>>, vector<1x512xf32>
    tpu.vector_store %arg5[%c0_9, %c0_10], %24 {strides = array<i32>} : memref<1x512xf32, #tpu.memory_space<vmem>>, vector<1x512xf32>,
    %c0_i32_11 = arith.constant 0 : i32
    %26 = arith.cmpi eq, %arg1, %c0_i32_11 : i32
    %27 = arith.extui %26 : i1 to i32
    %c0_i32_12 = arith.constant 0 : i32
    %28 = arith.cmpi ne, %27, %c0_i32_12 : i32
    scf.if %28 {
      %c0_13 = arith.constant 0 : index
      %c0_14 = arith.constant 0 : index
      %29 = vector.load %arg5[%c0_13, %c0_14] : memref<1x512xf32, #tpu.memory_space<vmem>>, vector<1x512xf32>
      %30 = vector.extract_strided_slice %29 {offsets = [0, 0], sizes = [1, 256], strides = [1, 1]} : vector<1x512xf32> to vector<1x256xf32>
      %31 = vector.extract_strided_slice %29 {offsets = [0, 256], sizes = [1, 256], strides = [1, 1]} : vector<1x512xf32> to vector<1x256xf32>
      %32 = arith.subf %30, %31 : vector<1x256xf32>
      %cst_15 = arith.constant 0.000000e+00 : f32
      %33 = vector.broadcast %cst_15 : f32 to vector<1x256xf32>
      %34 = arith.maximumf %32, %33 : vector<1x256xf32>
      %35 = math.absf %32 : vector<1x256xf32>
      %cst_16 = arith.constant 0.000000e+00 : f32
      %36 = vector.broadcast %cst_16 : f32 to vector<1x256xf32>
      %37 = arith.subf %36, %35 : vector<1x256xf32>
      %38 = math.exp %37 : vector<1x256xf32>
      %39 = math.log1p %38 : vector<1x256xf32>
      %40 = arith.addf %34, %39 : vector<1x256xf32>
      %c0_17 = arith.constant 0 : index
      %c0_18 = arith.constant 0 : index
      %41 = vector.load %arg4[%c0_17, %c0_18] : memref<1x256xf32, #tpu.memory_space<vmem>>, vector<1x256xf32>
      tpu.vector_store %arg4[%c0_17, %c0_18], %40 {strides = array<i32>} : memref<1x256xf32, #tpu.memory_space<vmem>>, vector<1x256xf32>,
    } else {
    }
    return
  }
  func.func @transform_0(%arg0: i32, %arg1: i32) -> (i32, i32) {
    %c0_i32 = arith.constant 0 : i32
    %c0_i32_0 = arith.constant 0 : i32
    return %c0_i32, %arg0 : i32, i32
  }
  func.func @transform_1(%arg0: i32, %arg1: i32) -> (i32, i32) {
    %c0_i32 = arith.constant 0 : i32
    %c0_i32_0 = arith.constant 0 : i32
    %c0_i32_1 = arith.constant 0 : i32
    return %c0_i32, %c0_i32_0 : i32, i32
  }
  func.func @transform_2(%arg0: i32, %arg1: i32) -> (i32, i32) {
    %c0_i32 = arith.constant 0 : i32
    %c0_i32_0 = arith.constant 0 : i32
    return %c0_i32, %arg0 : i32, i32
  }
}

</mosaic_0001>

<bundles_post_ra>
// kernel: tpu_custom_call.1
= control target key start
LH: loop header
LB: loop body
LE: loop exit
PB: predicated region body
PF: predicated region fallthrough
CT: control target
= control target key end

     0   :  { %v16_v0 = vlaneseq  ;;  %s434_s0 = inlined_call_operand.vmem [shape: s32[3,256], index: 0, kind: input, shape index: {}]   ;;  %s435_s1 = inlined_call_operand.vmem [shape: f32[32,8], index: 1, kind: input, shape index: {}]   ;;  %s436_s2 = inlined_call_operand.hbm [shape: f32[1,256], index: 2, kind: output, shape index: {}]  }
   0x1   :  { %v21_v1 = vld [vmem:[%s434_s0] ss:$4 sm:$0x3]  ;;  %v310_v2 = vld [vmem:[%s434_s0 + $0x1] ss:$4 sm:$0x3] }
   0x2   :  { %v26_v3 = vperm.slane %v21_v1, 0  ;;  %v27_v4 = vperm.slane %v21_v1, 1  ;;  %v28_v5 = vperm.slane %v310_v2, 0  ;;  %v33_v6 = vshrl.u32 %v16_v0, 7 }
   0x3   :  { %v29_v7 = vperm.slane %v310_v2, 1  ;;  %v311_v8 = vld [vmem:[%s434_s0 + $0x2] ss:$4 sm:$0x3] }
   0x4   :  { %v34_v9 = vperm.slane %v26_v3, 0  ;;  %v35_v10 = vperm.slane %v27_v4, 0  ;;  %v30_v11 = vperm.slane %v311_v8, 0  ;;  %v31_v12 = vperm.slane %v311_v8, 1 }
   0x5   :  { %v42_v13 = vperm.slane %v28_v5, 0  ;;  %v43_v14 = vperm.slane %v29_v7, 0 }
   0x6   :  { %7 = vsyncpa [#allocation4], 0  ;;  %vm36_vm0 = vcmp.eq.s32.totalorder %v33_v6, %v34_v9  ;;  %vm37_vm1 = vcmp.eq.s32.totalorder %v33_v6, %v35_v10  ;;  %v44_v15 = vperm.slane %v30_v11, 0  ;;  %v45_v16 = vperm.slane %v31_v12, 0  ;;  %v62_v28 = vld [vmem:[%s435_s1] sm:$0xff]  ;;  %v63_v29 = vld [vmem:[%s435_s1 + $0x8] sm:$0xff] }
   0x7   :  { %v366_v17 = vmov 0.0   ;;  %vm46_vm2 = vcmp.eq.s32.totalorder %v33_v6, %v42_v13  ;;  %vm47_vm3 = vcmp.eq.s32.totalorder %v33_v6, %v43_v14  ;;  %vm66_vm6 = vcmask 64512   ;;  %v64_v30 = vld [vmem:[%s435_s1 + $0x10] sm:$0xff]  ;;  %v65_v31 = vld [vmem:[%s435_s1 + $0x18] sm:$0xff]  ;;  %s367_s1 = smov [#allocation3]   ;;  %s301_s25 = sshll.u32 %s436_s2, 4  ;;  %s302_s25 = int_to_ptr.hbm [resolvable:$true] %s301_s25 }
   0x8   :  { %v312_v18 = vsel %vm36_vm0, 1.0, %v366_v17  ;;  %v313_v19 = vsel %vm37_vm1, 1.0, %v366_v17  ;;  %v314_v20 = vsel %vm46_vm2, 1.0, %v366_v17  ;;  %v315_v21 = vsel %vm47_vm3, 1.0, %v366_v17  ;;  %s299_s22 = sshll.u32 %s367_s1, 4  ;;  %s300_s22 = int_to_ptr.vmem [resolvable:$true] %s299_s22 }
   0x9   :  { %vm48_vm4 = vcmp.eq.s32.totalorder %v33_v6, %v44_v15  ;;  %vm49_vm5 = vcmp.eq.s32.totalorder %v33_v6, %v45_v16  ;;  %v58_v22 = vsub.f32 %v312_v18, %v314_v20  ;;  %v59_v23 = vsub.f32 %v313_v19, %v315_v21 }
   0xa   :  { %v316_v24 = vsel %vm48_vm4, 1.0, %v366_v17  ;;  %v317_v25 = vsel %vm49_vm5, 1.0, %v366_v17  ;;  %vm422_vm7 = vcmp.lt.s32.totalorder %v16_v0, 512  ;;  %vm255_vm8 = vcmask 1040384  }
   0xb   :  { %v60_v26 = vsub.f32 %v312_v18, %v316_v24  ;;  %v61_v27 = vsub.f32 %v313_v19, %v317_v25  ;;  %94 = vmatpush.msra.mxu0 %v58_v22  ;;  %123 = vmatpush.msra.mxu1 %v59_v23  ;;  %20 = vst.msk [vmem:[#allocation2] sm:$0xf] %vm422_vm7, %v366_v17  ;;  %vm257_vm9 = vcmask 1042434   ;;  %vm259_vm10 = vcmask 1041408  }
   0xc   :  { %318 = vmatmul.msk.f32.vlgmr.msra.gmra.mxu0 %vm66_vm6, %v62_v28  ;;  %322 = vmatmul.msk.f32.vlgmr.msra.gmra.mxu1 %vm66_vm6, %v62_v28  ;;  %vm291_vm12 = vcmp.lt.s32.totalorder %v16_v0, 256 }
   0xd   :  { %152 = vmatpush.msra.mxu2 %v60_v26  ;;  %181 = vmatpush.msra.mxu3 %v61_v27 }
   0xe   :  { %326 = vmatmul.msk.f32.vlgmr.msra.gmra.mxu2 %vm66_vm6, %v62_v28  ;;  %330 = vmatmul.msk.f32.vlgmr.msra.gmra.mxu3 %vm66_vm6, %v62_v28 }
  0x14   :  { %319 = vmatmul.msk.f32.gmra.mxu0 %vm66_vm6, %v63_v29  ;;  %323 = vmatmul.msk.f32.gmra.mxu1 %vm66_vm6, %v63_v29 }
  0x16   :  { %327 = vmatmul.msk.f32.gmra.mxu2 %vm66_vm6, %v63_v29  ;;  %331 = vmatmul.msk.f32.gmra.mxu3 %vm66_vm6, %v63_v29 }
  0x1c   :  { %320 = vmatmul.msk.f32.gmra.mxu0 %vm66_vm6, %v64_v30  ;;  %324 = vmatmul.msk.f32.gmra.mxu1 %vm66_vm6, %v64_v30 }
  0x1e   :  { %328 = vmatmul.msk.f32.gmra.mxu2 %vm66_vm6, %v64_v30  ;;  %332 = vmatmul.msk.f32.gmra.mxu3 %vm66_vm6, %v64_v30 }
  0x24   :  { %321 = vmatmul.msk.f32.gmra.mxu0 %vm66_vm6, %v65_v31  ;;  %325 = vmatmul.msk.f32.gmra.mxu1 %vm66_vm6, %v65_v31 }
  0x26   :  { %329 = vmatmul.msk.f32.gmra.mxu2 %vm66_vm6, %v65_v31  ;;  %333 = vmatmul.msk.f32.gmra.mxu3 %vm66_vm6, %v65_v31 }
  0x89   :  { %v96_v32 = vpop.f32.mrf.mxu0  ;;  %v125_v33 = vpop.f32.mrf.mxu1 }
  0x8a   :  { %v196_v43 = vmul.f32 %v96_v32, %v96_v32  ;;  %v197_v46 = vmul.f32 %v125_v33, %v125_v33 }
  0x91   :  { %v154_v34 = vpop.f32.mrf.mxu2  ;;  %v183_v35 = vpop.f32.mrf.mxu3 }
  0x92   :  { %v99_v36 = vpop.f32.mrf.mxu0  ;;  %v128_v37 = vpop.f32.mrf.mxu1  ;;  %v198_v61 = vmul.f32 %v154_v34, %v154_v34  ;;  %v199_v2 = vmul.f32 %v183_v35, %v183_v35 }
  0x93   :  { %v200_v44 = vmul.f32 %v99_v36, %v99_v36  ;;  %v201_v45 = vmul.f32 %v128_v37, %v128_v37 }
  0x95   :  { %v212_v49 = vadd.f32 %v200_v44, %v196_v43  ;;  %v221_v50 = vadd.f32 %v201_v45, %v197_v46 }
  0x99   :  { %v157_v39 = vpop.f32.mrf.mxu2  ;;  %v186_v40 = vpop.f32.mrf.mxu3 }
  0x9a   :  { %v102_v41 = vpop.f32.mrf.mxu0  ;;  %v131_v42 = vpop.f32.mrf.mxu1  ;;  %v202_v53 = vmul.f32 %v157_v39, %v157_v39  ;;  %v203_v60 = vmul.f32 %v186_v40, %v186_v40 }
  0x9b   :  { %v204_v47 = vmul.f32 %v102_v41, %v102_v41  ;;  %v205_v48 = vmul.f32 %v131_v42, %v131_v42  ;;  %v195_v42 = vld [vmem:[#allocation2] sm:$0xf] }
  0x9c   :  { %v230_v4 = vadd.f32 %v202_v53, %v198_v61  ;;  %v239_v7 = vadd.f32 %v203_v60, %v199_v2 }
  0x9d   :  { %v213_v56 = vadd.f32 %v212_v49, %v204_v47  ;;  %v222_v57 = vadd.f32 %v221_v50, %v205_v48 }
  0xa1   :  { %v160_v51 = vpop.f32.mrf.mxu2  ;;  %v189_v52 = vpop.f32.mrf.mxu3 }
  0xa2   :  { %v105_v54 = vpop.f32.mrf.mxu0  ;;  %v134_v55 = vpop.f32.mrf.mxu1  ;;  %v206_v62 = vmul.f32 %v160_v51, %v160_v51  ;;  %v207_v3 = vmul.f32 %v189_v52, %v189_v52 }
  0xa3   :  { %v208_v58 = vmul.f32 %v105_v54, %v105_v54  ;;  %v209_v59 = vmul.f32 %v134_v55, %v134_v55 }
  0xa4   :  { %v231_v8 = vadd.f32 %v230_v4, %v206_v62  ;;  %v240_v12 = vadd.f32 %v239_v7, %v207_v3 }
  0xa5   :  { %v214_v63 = vadd.f32 %v213_v56, %v208_v58  ;;  %v223_v1 = vadd.f32 %v222_v57, %v209_v59 }
  0xa7   :  { %v215_v5 = vrot.slane %v214_v63, 4  ;;  %v224_v6 = vrot.slane %v223_v1, 4 }
  0xa9   :  { %v225_v9 = vadd.f32 %v224_v6, %v223_v1  ;;  %v163_v10 = vpop.f32.mrf.mxu2  ;;  %v192_v11 = vpop.f32.mrf.mxu3  ;;  %v216_v13 = vadd.f32 %v215_v5, %v214_v63 }
  0xaa   :  { %v210_v14 = vmul.f32 %v163_v10, %v163_v10  ;;  %v211_v15 = vmul.f32 %v192_v11, %v192_v11 }
  0xab   :  { %v226_v16 = vrot.slane %v225_v9, 2  ;;  %v217_v20 = vrot.slane %v216_v13, 2 }
  0xac   :  { %v232_v17 = vadd.f32 %v231_v8, %v210_v14  ;;  %v241_v18 = vadd.f32 %v240_v12, %v211_v15 }
  0xad   :  { %v227_v19 = vadd.f32 %v226_v16, %v225_v9  ;;  %v218_v26 = vadd.f32 %v217_v20, %v216_v13 }
  0xae   :  { %v233_v21 = vrot.slane %v232_v17, 4  ;;  %v242_v22 = vrot.slane %v241_v18, 4 }
  0xaf   :  { %v228_v23 = vrot.slane %v227_v19, 1  ;;  %v219_v32 = vrot.slane %v218_v26, 1 }
  0xb0   :  { %v234_v24 = vadd.f32 %v233_v21, %v232_v17  ;;  %v243_v25 = vadd.f32 %v242_v22, %v241_v18 }
  0xb1   :  { %v229_v29 = vadd.f32 %v228_v23, %v227_v19  ;;  %v220_v39 = vadd.f32 %v219_v32, %v218_v26 }
  0xb2   :  { %v235_v27 = vrot.slane %v234_v24, 2  ;;  %v244_v28 = vrot.slane %v243_v25, 2 }
  0xb3   :  { %v252_v35 = vrot.slane %v229_v29, 7 }
  0xb4   :  { %v236_v30 = vadd.f32 %v235_v27, %v234_v24  ;;  %v245_v31 = vadd.f32 %v244_v28, %v243_v25 }
  0xb5   :  { %v256_v43 = vsel %vm255_vm8, %v220_v39, %v252_v35 }
  0xb6   :  { %v237_v33 = vrot.slane %v236_v30, 1  ;;  %v246_v34 = vrot.slane %v245_v31, 1 }
  0xb8   :  { %v238_v36 = vadd.f32 %v237_v33, %v236_v30  ;;  %v247_v37 = vadd.f32 %v246_v34, %v245_v31 }
  0xba   :  { %v253_v40 = vrot.slane %v238_v36, 6  ;;  %v254_v41 = vrot.slane %v247_v37, 5 }
  0xbc   :  { %v258_v44 = vsel %vm257_vm9, %v253_v40, %v254_v41 }
  0xbd   :  { %v260_v45 = vsel %vm259_vm10, %v256_v43, %v258_v44 }
  0xbe   :  { %v262_v46 = vadd.f32 %v260_v45, %v195_v42 }
  0xc0   :  { %267 = vst.msk [vmem:[#allocation2] sm:$0xf] %vm422_vm7, %v262_v46 }
  0xc7   :  { %v271_v47 = vld [vmem:[#allocation2] sm:$0xf] }
  0xc8   :  { %v273_v48 = vrot.slane %v271_v47, 2 }
  0xca   :  { %v275_v49 = vsub.f32 %v271_v47, %v273_v48 }
  0xcc   :  { %v277_v50 = vand.u32 2147483647, %v275_v49  ;;  %v276_v38 = vmax.f32 %v275_v49, 0.0 }
  0xce   :  { %v278_v51 = vsub.f32 0.0, %v277_v50 }
  0xd0   :  { %v279_v52 = vmul.f32 1.442695, %v278_v51 }
  0xd2   :  { %336 = vpow2.f32 %v279_v52 }
  0xd8   :  { %v337_v53 = vpop.eup %336 }
  0xd9   :  { %v281_v54 = vadd.f32 1.0, %v337_v53  ;;  %v284_v55 = vmul.f32 -0.5, %v337_v53  ;;  %v287_v57 = vand.u32 2147483647, %v337_v53 }
  0xdb   :  { %338 = vlog2.f32 %v281_v54  ;;  %v285_v56 = vadd.f32 1.0, %v284_v55  ;;  %vm288_vm11 = vcmp.lt.f32.partialorder %v287_v57, 0.0004427343 }
  0xdd   :  { %v286_v60 = vmul.f32 %v337_v53, %v285_v56 }
  0xe1   :  { %v339_v58 = vpop.eup %338 }
  0xe2   :  { %v283_v59 = vmul.f32 0.6931472, %v339_v58 }
  0xe4   :  { %v289_v61 = vsel %vm288_vm11, %v286_v60, %v283_v59 }
  0xe5   :  { %v290_v62 = vadd.f32 %v289_v61, %v276_v38 }
  0xe7   :  { %293 = vst.msk [vmem:[#allocation3] sm:$0x3] %vm291_vm12, %v290_v62 }
  0xe8   :  { %304 = dma.vmem_to_hbm [thread:$0]  %s300_s22, 32, %s302_s25, [#allocation4]  }
  0xe9   :  { %364 = dma.done.wait [#allocation4], 32  }
  0xea   :  { %365 = vsyncadd [#allocation4], 4294967264 }
  0xeb   :  { %309 = vsyncpa [#allocation4], 1 }

</bundles_post_ra>
